<compile_context>
chip_gen: v7x
topology: tpu7x:2x2x1
jax: 0.10.0
libtpu: 0.0.40
codegen_flags: <defaults>
</compile_context>

<pallas_src>
import jax
import jax.numpy as jnp
from jax.experimental import pallas as pl
from jax.experimental.pallas import tpu as pltpu

LATENT_SIZE = 128      # latent_size in the PyTorch module
FEATURE_DIM = 63       # config.DATASET.FEATURE_DIM (synthetic; +1 att -> 64)
NUM_SEGMENTS = 8       # config.DATASET.NUM_SEGMENTS (synthetic)


def _round_up(a, b):
    return (a + b - 1) // b * b


def _cdiv(a, b):
    return (a + b - 1) // b


def _cencoder_kernel(x_ref, att_ref, w1a_ref, w1b_ref, b1_ref,
                     w2_ref, b2_ref, w3_ref, b3_ref, out_ref):
    # fc1 + ReLU: bf16 MXU operands, f32 accumulate.  The att column of W1 is
    # a rank-1 f32 VPU update, so the wrapper never materializes
    # concat([x, att]) in HBM.
    h = jnp.dot(x_ref[...].astype(jnp.bfloat16), w1a_ref[...],
                preferred_element_type=jnp.float32)
    h = h + att_ref[...] * w1b_ref[...] + b1_ref[...]
    h = jnp.maximum(h, 0.0)
    # fc2 + ReLU (bf16 MXU operands, f32 accumulate, f32 epilogue).
    h = jnp.dot(h.astype(jnp.bfloat16), w2_ref[...],
                preferred_element_type=jnp.float32)
    h = jnp.maximum(h + b2_ref[...], 0.0)
    # fc3 -> fused (mu | logvar): one 256-lane, lane-dense store.
    o = jnp.dot(h.astype(jnp.bfloat16), w3_ref[...],
                preferred_element_type=jnp.float32)
    out_ref[...] = (o + b3_ref[...]).astype(out_ref.dtype)


def _choose_row_tiling(M, tm):
    """Balanced row tiles.

    * big steps (default cap tm=2048, 128-multiple) amortize the ~0.35us
      per-grid-step overhead,
    * >=2 steps once M >= 256 so both v7x TensorCores are fed,
    * per-step tile at sublane (8-row) granularity so dead/padded rows stay
      < 8*nsteps total (the kernel is HBM-write-bound; dead-row output writes
      are pure waste, and MXU efficiency does not need 128-aligned M).
    """
    tm = max(128, _round_up(tm, 128))
    nsteps = max(1, _cdiv(M, tm))
    if M >= 256:
        nsteps = max(nsteps, 2)       # v7x: 2 TCs; near-free on v5e/v6e
    tm_eff = _round_up(_cdiv(M, nsteps), 8)
    m_pad = nsteps * tm_eff
    return tm_eff, nsteps, m_pad


def cencoder_forward(x, att, params, *, tm=2048, out_dtype=jnp.float32):
    """x: (B, NUM_SEGMENTS, FEATURE_DIM) f32, att: (B, NUM_SEGMENTS) f32.

    Returns (mu, logvar), each (B, NUM_SEGMENTS, LATENT_SIZE) in `out_dtype`.
    Pass out_dtype=jnp.bfloat16 when downstream consumers accept bf16; the
    fused output is ~80% of all HBM traffic, so this is ~1.6x end-to-end.
    """
    w1, b1, w2, b2, w3, b3 = params
    B, S, F = x.shape
    assert S == NUM_SEGMENTS and F == FEATURE_DIM
    M = B * S

    tm_eff, nsteps, m_pad = _choose_row_tiling(M, tm)

    x2d = x.reshape(M, F)            # no-copy reshapes
    att2d = att.reshape(M, 1)
    if m_pad != M:
        x2d = jnp.pad(x2d, ((0, m_pad - M), (0, 0)))
        att2d = jnp.pad(att2d, ((0, m_pad - M), (0, 0)))

    # Split W1 into the x-part (bf16 MXU operand) and the att column (f32 VPU);
    # fc2/fc3 weights in bf16.  Weights stay VMEM-resident across the grid.
    w1a = w1[:F].astype(jnp.bfloat16)
    w1b = w1[F:F + 1]
    w2b = w2.astype(jnp.bfloat16)
    w3b = w3.astype(jnp.bfloat16)

    out_bytes = jnp.dtype(out_dtype).itemsize

    # Advisory cost hint so XLA can schedule/overlap neighbours around this
    # short, HBM-bound custom call.
    flops = 2 * m_pad * (F * LATENT_SIZE
                         + LATENT_SIZE * LATENT_SIZE
                         + LATENT_SIZE * 2 * LATENT_SIZE)
    weight_bytes = ((F + 1) * LATENT_SIZE * 2 + LATENT_SIZE * LATENT_SIZE * 2
                    + LATENT_SIZE * 2 * LATENT_SIZE * 2
                    + 4 * LATENT_SIZE * 4 + 2 * LATENT_SIZE * 4)
    bytes_accessed = m_pad * ((F + 1) * 4 + 2 * LATENT_SIZE * out_bytes) + weight_bytes
    cost = pl.CostEstimate(flops=flops, transcendentals=0,
                           bytes_accessed=bytes_accessed)

    # VMEM estimate: double-buffered x / att / out tiles (the (tm,1) att block
    # lane-pads to 128 lanes) plus ~2 MiB weights/scratch headroom.  The
    # default tm=2048 fits every chip's default scoped limit (v5e 16 MiB);
    # only raise the limit when a bigger user tile actually needs it.
    vmem_est = 2 * tm_eff * (128 * 4 + 128 * 4 + 2 * LATENT_SIZE * out_bytes) + (2 << 20)
    vmem_limit = int(vmem_est) if vmem_est > (14 << 20) else None

    full = lambda i: (0, 0)
    out = pl.pallas_call(
        _cencoder_kernel,
        out_shape=jax.ShapeDtypeStruct((m_pad, 2 * LATENT_SIZE), out_dtype),
        grid_spec=pltpu.PrefetchScalarGridSpec(
            num_scalar_prefetch=0,
            grid=(nsteps,),
            in_specs=[
                pl.BlockSpec((tm_eff, F), lambda i: (i, 0)),          # x tile
                pl.BlockSpec((tm_eff, 1), lambda i: (i, 0)),          # att tile
                pl.BlockSpec((F, LATENT_SIZE), full),                 # W1[:F] (bf16)
                pl.BlockSpec((1, LATENT_SIZE), full),                 # W1[F] att col (f32)
                pl.BlockSpec((1, LATENT_SIZE), full),                 # b1
                pl.BlockSpec((LATENT_SIZE, LATENT_SIZE), full),       # W2 (bf16)
                pl.BlockSpec((1, LATENT_SIZE), full),                 # b2
                pl.BlockSpec((LATENT_SIZE, 2 * LATENT_SIZE), full),   # W3 (bf16)
                pl.BlockSpec((1, 2 * LATENT_SIZE), full),             # b3
            ],
            out_specs=pl.BlockSpec((tm_eff, 2 * LATENT_SIZE),
                                   lambda i: (i, 0)),                 # fused mu|logvar
        ),
        compiler_params=pltpu.CompilerParams(
            dimension_semantics=("parallel",),
            vmem_limit_bytes=vmem_limit),
        cost_estimate=cost,
    )(x2d, att2d, w1a, w1b, b1, w2b, b2, w3b, b3)

    fused = out[:M].reshape(B, S, 2 * LATENT_SIZE)
    return fused[..., :LATENT_SIZE], fused[..., LATENT_SIZE:]


def init_params(key):
    """Deterministic init matching nn.Linear shapes (stored as (in, out), f32)."""
    d_in = FEATURE_DIM + 1
    k = jax.random.split(key, 6)

    def lin(kw, kb, fan_in, fan_out):
        bound = 1.0 / jnp.sqrt(fan_in)
        w = jax.random.uniform(kw, (fan_in, fan_out), jnp.float32, -bound, bound)
        b = jax.random.uniform(kb, (1, fan_out), jnp.float32, -bound, bound)
        return w, b

    w1, b1 = lin(k[0], k[1], d_in, LATENT_SIZE)
    w2, b2 = lin(k[2], k[3], LATENT_SIZE, LATENT_SIZE)
    w3, b3 = lin(k[4], k[5], LATENT_SIZE, 2 * LATENT_SIZE)
    return (w1, b1, w2, b2, w3, b3)


def _reference(x, att, params):
    """Plain-JAX reference mirroring the kernel's dtype strategy."""
    w1, b1, w2, b2, w3, b3 = params
    F = FEATURE_DIM
    att = att.reshape(x.shape[0], NUM_SEGMENTS, 1)
    h = jnp.dot(x.astype(jnp.bfloat16), w1[:F].astype(jnp.bfloat16),
                preferred_element_type=jnp.float32)
    h = jnp.maximum(h + att * w1[F] + b1[0], 0.0)
    h = jnp.dot(h.astype(jnp.bfloat16), w2.astype(jnp.bfloat16),
                preferred_element_type=jnp.float32)
    h = jnp.maximum(h + b2[0], 0.0)
    o = jnp.dot(h.astype(jnp.bfloat16), w3.astype(jnp.bfloat16),
                preferred_element_type=jnp.float32) + b3[0]
    return o[..., :LATENT_SIZE], o[..., LATENT_SIZE:]


if __name__ == "__main__":
    key = jax.random.PRNGKey(0)
    kp, kx1, ka1, kx2, ka2 = jax.random.split(key, 5)
    params = init_params(kp)

    # Small case (single grid step, tiny 8-row-aligned tile) and a larger case
    # (B=71 -> M=568) that exercises the balanced 2-step grid plus row padding.
    cases = [(2, kx1, ka1), (71, kx2, ka2)]
    for B, kx, ka in cases:
        x = jax.random.normal(kx, (B, NUM_SEGMENTS, FEATURE_DIM), jnp.float32)
        att = jax.random.uniform(ka, (B, NUM_SEGMENTS), jnp.float32)

        mu, lv = cencoder_forward(x, att, params)
        jax.block_until_ready((mu, lv))

        mu_ref, lv_ref = _reference(x, att, params)
        assert mu.shape == (B, NUM_SEGMENTS, LATENT_SIZE)
        assert lv.shape == (B, NUM_SEGMENTS, LATENT_SIZE)
        assert jnp.allclose(mu, mu_ref, atol=2e-2, rtol=2e-2)
        assert jnp.allclose(lv, lv_ref, atol=2e-2, rtol=2e-2)

    # Optional bf16 output path (halves the dominant HBM write stream).
    xb = jax.random.normal(kx2, (4, NUM_SEGMENTS, FEATURE_DIM), jnp.float32)
    ab = jax.random.uniform(ka2, (4, NUM_SEGMENTS), jnp.float32)
    mu_b, lv_b = cencoder_forward(xb, ab, params, out_dtype=jnp.bfloat16)
    jax.block_until_ready((mu_b, lv_b))
    mu_r, lv_r = _reference(xb, ab, params)
    assert jnp.allclose(mu_b.astype(jnp.float32), mu_r, atol=5e-2, rtol=5e-2)
    assert jnp.allclose(lv_b.astype(jnp.float32), lv_r, atol=5e-2, rtol=5e-2)

    print("KERNEL_OK")
</pallas_src>

<mosaic_0001>
module attributes {stable_mosaic.version = 11 : i64} {
  func.func @_cencoder_kernel(%arg0: i32, %arg1: memref<16x63xf32, #tpu.memory_space<vmem>>, %arg2: memref<16x1xf32, #tpu.memory_space<vmem>>, %arg3: memref<63x128xbf16, #tpu.memory_space<vmem>>, %arg4: memref<1x128xf32, #tpu.memory_space<vmem>>, %arg5: memref<1x128xf32, #tpu.memory_space<vmem>>, %arg6: memref<128x128xbf16, #tpu.memory_space<vmem>>, %arg7: memref<1x128xf32, #tpu.memory_space<vmem>>, %arg8: memref<128x256xbf16, #tpu.memory_space<vmem>>, %arg9: memref<1x256xf32, #tpu.memory_space<vmem>>, %arg10: memref<16x256xf32, #tpu.memory_space<vmem>>) attributes {dimension_semantics = [#tpu.dimension_semantics<parallel>], iteration_bounds = array<i64: 1>, scalar_prefetch = 0 : i64, scratch_operands = 0 : i64, tpu.core_type = #tpu.core_type<tc>, window_params = [{transform_indices = @transform_0, window_bounds = array<i64: 16, 63>}, {transform_indices = @transform_1, window_bounds = array<i64: 16, 1>}, {pipeline_mode = #tpu.pipeline_mode<synchronous>, transform_indices = @transform_2, window_bounds = array<i64: 63, 128>}, {pipeline_mode = #tpu.pipeline_mode<synchronous>, transform_indices = @transform_3, window_bounds = array<i64: 1, 128>}, {pipeline_mode = #tpu.pipeline_mode<synchronous>, transform_indices = @transform_4, window_bounds = array<i64: 1, 128>}, {pipeline_mode = #tpu.pipeline_mode<synchronous>, transform_indices = @transform_5, window_bounds = array<i64: 128, 128>}, {pipeline_mode = #tpu.pipeline_mode<synchronous>, transform_indices = @transform_6, window_bounds = array<i64: 1, 128>}, {pipeline_mode = #tpu.pipeline_mode<synchronous>, transform_indices = @transform_7, window_bounds = array<i64: 128, 256>}, {pipeline_mode = #tpu.pipeline_mode<synchronous>, transform_indices = @transform_8, window_bounds = array<i64: 1, 256>}, {transform_indices = @transform_9, window_bounds = array<i64: 16, 256>}]} {
    %c0 = arith.constant 0 : index
    %c0_0 = arith.constant 0 : index
    %0 = vector.load %arg1[%c0, %c0_0] : memref<16x63xf32, #tpu.memory_space<vmem>>, vector<16x63xf32>
    %1 = arith.truncf %0 : vector<16x63xf32> to vector<16x63xbf16>
    %c0_1 = arith.constant 0 : index
    %c0_2 = arith.constant 0 : index
    %2 = vector.load %arg3[%c0_1, %c0_2] : memref<63x128xbf16, #tpu.memory_space<vmem>>, vector<63x128xbf16>
    %cst = arith.constant dense<0.000000e+00> : vector<16x128xf32>
    %3 = tpu.matmul %1, %2, %cst {dimension_numbers = #tpu.dot_dimension_numbers<[1], [0], [0], [1], [0, 0, 1, 1], [], []>} : vector<16x63xbf16>, vector<63x128xbf16>, vector<16x128xf32> -> vector<16x128xf32>
    %c0_3 = arith.constant 0 : index
    %c0_4 = arith.constant 0 : index
    %4 = vector.load %arg2[%c0_3, %c0_4] : memref<16x1xf32, #tpu.memory_space<vmem>>, vector<16x1xf32>
    %c0_5 = arith.constant 0 : index
    %c0_6 = arith.constant 0 : index
    %5 = vector.load %arg4[%c0_5, %c0_6] : memref<1x128xf32, #tpu.memory_space<vmem>>, vector<1x128xf32>
    %6 = vector.broadcast %4 : vector<16x1xf32> to vector<16x128xf32>
    %7 = vector.broadcast %5 : vector<1x128xf32> to vector<16x128xf32>
    %8 = arith.mulf %6, %7 : vector<16x128xf32>
    %9 = arith.addf %3, %8 : vector<16x128xf32>
    %c0_7 = arith.constant 0 : index
    %c0_8 = arith.constant 0 : index
    %10 = vector.load %arg5[%c0_7, %c0_8] : memref<1x128xf32, #tpu.memory_space<vmem>>, vector<1x128xf32>
    %11 = vector.broadcast %10 : vector<1x128xf32> to vector<16x128xf32>
    %12 = arith.addf %9, %11 : vector<16x128xf32>
    %cst_9 = arith.constant 0.000000e+00 : f32
    %13 = vector.broadcast %cst_9 : f32 to vector<16x128xf32>
    %14 = arith.maximumf %12, %13 : vector<16x128xf32>
    %15 = arith.truncf %14 : vector<16x128xf32> to vector<16x128xbf16>
    %c0_10 = arith.constant 0 : index
    %c0_11 = arith.constant 0 : index
    %16 = vector.load %arg6[%c0_10, %c0_11] : memref<128x128xbf16, #tpu.memory_space<vmem>>, vector<128x128xbf16>
    %cst_12 = arith.constant dense<0.000000e+00> : vector<16x128xf32>
    %17 = tpu.matmul %15, %16, %cst_12 {dimension_numbers = #tpu.dot_dimension_numbers<[1], [0], [0], [1], [0, 0, 1, 1], [], []>} : vector<16x128xbf16>, vector<128x128xbf16>, vector<16x128xf32> -> vector<16x128xf32>
    %c0_13 = arith.constant 0 : index
    %c0_14 = arith.constant 0 : index
    %18 = vector.load %arg7[%c0_13, %c0_14] : memref<1x128xf32, #tpu.memory_space<vmem>>, vector<1x128xf32>
    %19 = vector.broadcast %18 : vector<1x128xf32> to vector<16x128xf32>
    %20 = arith.addf %17, %19 : vector<16x128xf32>
    %cst_15 = arith.constant 0.000000e+00 : f32
    %21 = vector.broadcast %cst_15 : f32 to vector<16x128xf32>
    %22 = arith.maximumf %20, %21 : vector<16x128xf32>
    %23 = arith.truncf %22 : vector<16x128xf32> to vector<16x128xbf16>
    %c0_16 = arith.constant 0 : index
    %c0_17 = arith.constant 0 : index
    %24 = vector.load %arg8[%c0_16, %c0_17] : memref<128x256xbf16, #tpu.memory_space<vmem>>, vector<128x256xbf16>
    %cst_18 = arith.constant dense<0.000000e+00> : vector<16x256xf32>
    %25 = tpu.matmul %23, %24, %cst_18 {dimension_numbers = #tpu.dot_dimension_numbers<[1], [0], [0], [1], [0, 0, 1, 1], [], []>} : vector<16x128xbf16>, vector<128x256xbf16>, vector<16x256xf32> -> vector<16x256xf32>
    %c0_19 = arith.constant 0 : index
    %c0_20 = arith.constant 0 : index
    %26 = vector.load %arg9[%c0_19, %c0_20] : memref<1x256xf32, #tpu.memory_space<vmem>>, vector<1x256xf32>
    %27 = vector.broadcast %26 : vector<1x256xf32> to vector<16x256xf32>
    %28 = arith.addf %25, %27 : vector<16x256xf32>
    %c0_21 = arith.constant 0 : index
    %c0_22 = arith.constant 0 : index
    %29 = vector.load %arg10[%c0_21, %c0_22] : memref<16x256xf32, #tpu.memory_space<vmem>>, vector<16x256xf32>
    tpu.vector_store %arg10[%c0_21, %c0_22], %28 {strides = array<i32>} : memref<16x256xf32, #tpu.memory_space<vmem>>, vector<16x256xf32>,
    return
  }
  func.func @transform_0(%arg0: i32) -> (i32, i32) {
    %c0_i32 = arith.constant 0 : i32
    %c0_i32_0 = arith.constant 0 : i32
    return %arg0, %c0_i32 : i32, i32
  }
  func.func @transform_1(%arg0: i32) -> (i32, i32) {
    %c0_i32 = arith.constant 0 : i32
    %c0_i32_0 = arith.constant 0 : i32
    return %arg0, %c0_i32 : i32, i32
  }
  func.func @transform_2(%arg0: i32) -> (i32, i32) {
    %c0_i32 = arith.constant 0 : i32
    %c0_i32_0 = arith.constant 0 : i32
    %c0_i32_1 = arith.constant 0 : i32
    return %c0_i32, %c0_i32_0 : i32, i32
  }
  func.func @transform_3(%arg0: i32) -> (i32, i32) {
    %c0_i32 = arith.constant 0 : i32
    %c0_i32_0 = arith.constant 0 : i32
    %c0_i32_1 = arith.constant 0 : i32
    return %c0_i32, %c0_i32_0 : i32, i32
  }
  func.func @transform_4(%arg0: i32) -> (i32, i32) {
    %c0_i32 = arith.constant 0 : i32
    %c0_i32_0 = arith.constant 0 : i32
    %c0_i32_1 = arith.constant 0 : i32
    return %c0_i32, %c0_i32_0 : i32, i32
  }
  func.func @transform_5(%arg0: i32) -> (i32, i32) {
    %c0_i32 = arith.constant 0 : i32
    %c0_i32_0 = arith.constant 0 : i32
    %c0_i32_1 = arith.constant 0 : i32
    return %c0_i32, %c0_i32_0 : i32, i32
  }
  func.func @transform_6(%arg0: i32) -> (i32, i32) {
    %c0_i32 = arith.constant 0 : i32
    %c0_i32_0 = arith.constant 0 : i32
    %c0_i32_1 = arith.constant 0 : i32
    return %c0_i32, %c0_i32_0 : i32, i32
  }
  func.func @transform_7(%arg0: i32) -> (i32, i32) {
    %c0_i32 = arith.constant 0 : i32
    %c0_i32_0 = arith.constant 0 : i32
    %c0_i32_1 = arith.constant 0 : i32
    return %c0_i32, %c0_i32_0 : i32, i32
  }
  func.func @transform_8(%arg0: i32) -> (i32, i32) {
    %c0_i32 = arith.constant 0 : i32
    %c0_i32_0 = arith.constant 0 : i32
    %c0_i32_1 = arith.constant 0 : i32
    return %c0_i32, %c0_i32_0 : i32, i32
  }
  func.func @transform_9(%arg0: i32) -> (i32, i32) {
    %c0_i32 = arith.constant 0 : i32
    %c0_i32_0 = arith.constant 0 : i32
    return %arg0, %c0_i32 : i32, i32
  }
}

</mosaic_0001>

<bundles_post_ra>
// kernel: tpu_custom_call.1
= control target key start
LH: loop header
LB: loop body
LE: loop exit
PB: predicated region body
PF: predicated region fallthrough
CT: control target
= control target key end

     0   :  { %14 = vsyncpa [#allocation3], 0  ;;  %s848_s0 = inlined_call_operand.vmem [shape: f32[16,63], index: 0, kind: input, shape index: {}]   ;;  %s849_s1 = inlined_call_operand.vmem [shape: f32[16,1], index: 1, kind: input, shape index: {}]   ;;  %s850_s2 = inlined_call_operand.hbm [shape: bf16[63,128], index: 2, kind: input, shape index: {}]   ;;  %s851_s3 = inlined_call_operand.vmem [shape: f32[1,128], index: 3, kind: input, shape index: {}]   ;;  %s852_s4 = inlined_call_operand.vmem [shape: f32[1,128], index: 4, kind: input, shape index: {}]   ;;  %s853_s5 = inlined_call_operand.hbm [shape: bf16[128,128], index: 5, kind: input, shape index: {}]   ;;  %s854_s6 = inlined_call_operand.vmem [shape: f32[1,128], index: 6, kind: input, shape index: {}]   ;;  %s855_s7 = inlined_call_operand.hbm [shape: bf16[128,256], index: 7, kind: input, shape index: {}]   ;;  %s856_s8 = inlined_call_operand.vmem [shape: f32[1,256], index: 8, kind: input, shape index: {}]   ;;  %s857_s9 = inlined_call_operand.hbm [shape: f32[16,256], index: 9, kind: output, shape index: {}]  }
   0x1   :  { %15 = vsyncpa [#allocation6], 0 }
   0x2   :  { %16 = vsyncpa [#allocation4], 0  ;;  %s705_s30 = smov [#allocation5]   ;;  %s706_s11 = smov [#allocation2]  }
   0x3   :  { %s42_s10 = sshll.u32 %s705_s30, 4  ;;  %s26_s12 = sshll.u32 %s706_s11, 4  ;;  %s43_s10 = int_to_ptr.vmem [resolvable:$true] %s42_s10  ;;  %s769_s12 = int_to_ptr.vmem [resolvable:$true] %s26_s12 }
   0x4   :  { %s611_s15 = scalar_lea.hbm %s853_s5, 1024 }
   0x5   :  { %p612_p0 = scmp.ne.s32.totalorder %s853_s5, %s611_s15  ;;  %p615_p1 = scmp.lt.u32.totalorder %s611_s15, %s853_s5 }
   0x7   :  { %p617_p2 = pnand %p615_p1, %p612_p0 }
   0x9   :  { %620 = shalt.err (!%p617_p2)
}
   0xa   :  { %s621_s20 = scalar_lea.vmem %s43_s10, 1024  ;;  %p626_p4 = scmp.lt.s32.totalorder %s43_s10, %s43_s10 }
   0xb   :  { %p622_p3 = scmp.ne.s32.totalorder %s43_s10, %s621_s20  ;;  %p627_p5 = scmp.lt.s32.totalorder %s621_s20, %s621_s20 }
   0xd   :  { %p628_p6 = por %p627_p5, %p626_p4 }
   0xf   :  { %p629_p7 = pnand %p628_p6, %p622_p3 }
  0x11   :  { %632 = shalt.err (!%p629_p7)
}
  0x12   :  { %s707_s21 = smov 64   ;;  %s708_s22 = smov 4  }
  0x13   :  { %48 = dma.hbm_to_vmem [thread:$0]  %s853_s5, 1024, %s43_s10, [#allocation6], %s707_s21, %s707_s21, %s708_s22  }
  0x14   :  { %s633_s27 = scalar_lea.hbm %s850_s2, 512 }
  0x15   :  { %p634_p8 = scmp.ne.s32.totalorder %s850_s2, %s633_s27  ;;  %p637_p9 = scmp.lt.u32.totalorder %s633_s27, %s850_s2 }
  0x17   :  { %p639_p10 = pnand %p637_p9, %p634_p8 }
  0x19   :  { %642 = shalt.err (!%p639_p10)
}
  0x1a   :  { %s643_s13 = scalar_lea.vmem %s769_s12, 512  ;;  %p648_p12 = scmp.lt.s32.totalorder %s769_s12, %s769_s12 }
  0x1b   :  { %p644_p11 = scmp.ne.s32.totalorder %s769_s12, %s643_s13  ;;  %p649_p13 = scmp.lt.s32.totalorder %s643_s13, %s643_s13 }
  0x1d   :  { %p650_p0 = por %p649_p13, %p648_p12 }
  0x1f   :  { %p651_p1 = pnand %p650_p0, %p644_p11 }
  0x21   :  { %654 = shalt.err (!%p651_p1)
}
  0x22   :  { %32 = dma.hbm_to_vmem [thread:$0]  %s850_s2, 512, %s769_s12, [#allocation3], %s707_s21, %s707_s21, %s708_s22  }
  0x23   :  { %s709_s14 = smov [#allocation7]   ;;  %s655_s18 = scalar_lea.hbm %s855_s7, 2048 }
  0x24   :  { %s56_s15 = sshll.u32 %s709_s14, 4  ;;  %p656_p2 = scmp.ne.s32.totalorder %s855_s7, %s655_s18  ;;  %s57_s15 = int_to_ptr.vmem [resolvable:$true] %s56_s15 }
  0x25   :  { %p659_p3 = scmp.lt.u32.totalorder %s655_s18, %s855_s7 }
  0x27   :  { %p661_p4 = pnand %p659_p3, %p656_p2 }
  0x29   :  { %664 = shalt.err (!%p661_p4)
}
  0x2a   :  { %s665_s25 = scalar_lea.vmem %s57_s15, 2048  ;;  %p670_p6 = scmp.lt.s32.totalorder %s57_s15, %s57_s15 }
  0x2b   :  { %p666_p5 = scmp.ne.s32.totalorder %s57_s15, %s665_s25  ;;  %p671_p7 = scmp.lt.s32.totalorder %s665_s25, %s665_s25 }
  0x2d   :  { %p672_p8 = por %p671_p7, %p670_p6 }
  0x2f   :  { %p673_p9 = pnand %p672_p8, %p666_p5 }
  0x31   :  { %676 = shalt.err (!%p673_p9)
}
  0x32   :  { %s710_s2 = smov 128   ;;  %s711_s12 = smov 8  }
  0x33   :  { %62 = dma.hbm_to_vmem [thread:$0]  %s855_s7, 2048, %s57_s15, [#allocation6], %s710_s2, %s710_s2, %s711_s12  }
  0x34   :  { %699 = dma.done.wait [#allocation3], 512  }
  0x35   :  { %700 = vsyncadd [#allocation3], 4294966784 }
  0x36   :  { %701 = dma.done.wait [#allocation6], 3072  }
  0x37   :  { %702 = vsyncadd [#allocation6], 4294964224  ;;  %v712_v0 = vmov 0.0   ;;  %vm713_vm0 = vmmov 0   ;;  %v714_v1 = vmov 0   ;;  %v575_v2 = vld [vmem:[#allocation2] sm:$0xff]  }
  0x38   :  { %528 = vmatprep.subr.bf16.mxu0 %v712_v0  ;;  %540 = vmatprep.subr.bf16.mxu1 %v712_v0  ;;  %vm134_vm1 = vcmask 1046528   ;;  %v576_v3 = vld [vmem:[#allocation2 + $0x8] sm:$0xff]   ;;  %v577_v4 = vld [vmem:[#allocation2 + $0x10] sm:$0xff]   ;;  %v578_v5 = vld [vmem:[#allocation2 + $0x18] sm:$0xff]   ;;  %vm135_vm2 = vcmask 1047552   ;;  %v715_v6 = vmov 65535  }
  0x39   :  { %536 = vmatprep.mubr.msk.bf16.mxu0 %vm713_vm0, %v712_v0  ;;  %574 = vset.pattern.permute.xlu0 %v714_v1  ;;  %v136_v7 = vsel %vm134_vm1, 4294967295, %v715_v6  ;;  %v86_v8 = vld [vmem:[%s849_s1] sm:$0xff]  ;;  %v87_v9 = vld [vmem:[%s849_s1 + $0x8] sm:$0xff]  ;;  %v581_v16 = vld [vmem:[#allocation5 + $0x10] sm:$0xff]   ;;  %vm130_vm3 = vcmask 515072  }
  0x3a   :  { %556 = vmatprep.mubr.msk.bf16.mxu1 %vm713_vm0, %v712_v0  ;;  %529 = vmatpush3.bf16.msra.mxu0 %v575_v2  ;;  %v579_v10 = vld [vmem:[#allocation5] sm:$0xff]   ;;  %v137_v11 = vsel %vm135_vm2, %v136_v7, 0  ;;  %v580_v12 = vld [vmem:[#allocation5 + $0x8] sm:$0xff]   ;;  %v582_v18 = vld [vmem:[#allocation5 + $0x18] sm:$0xff]   ;;  %v327_v2 = vlaneseq }
  0x3b   :  { %530 = vmatprep.subr.bf16.mxu0 %v712_v0  ;;  %91 = vperm.xlu0 %574, %v86_v8   ;;  %v75_v13 = vld [vmem:[%s848_s0] sm:$0xff]  ;;  %v76_v14 = vld [vmem:[%s848_s0 + $0x8] sm:$0xff]  ;;  %v139_v15 = vand.u32 %v578_v5, %v137_v11  ;;  %v585_v21 = vld [vmem:[#allocation5 + $0x30] sm:$0xff]  }
  0x3c   :  { %541 = vmatpush3.bf16.msra.mxu1 %v579_v10  ;;  %v77_v17 = vpack.c.bf16 %v76_v14, %v75_v13  ;;  %v583_v19 = vld [vmem:[#allocation5 + $0x20] sm:$0xff]   ;;  %v584_v20 = vld [vmem:[#allocation5 + $0x28] sm:$0xff]   ;;  %v586_v22 = vld [vmem:[#allocation5 + $0x38] sm:$0xff]  }
  0x3d   :  { %542 = vmatprep.subr.bf16.mxu1 %v712_v0  ;;  %v587_v23 = vld [vmem:[#allocation7] ss:$8 sps:$4 sm:$0xff]   ;;  %v589_v24 = vld [vmem:[#allocation7 + $0x4] ss:$8 sps:$4 sm:$0xff]   ;;  %v592_v25 = vld [vmem:[#allocation7 + $0x14] ss:$8 sps:$4 sm:$0xff]  }
  0x3e   :  { %531 = vmatpush3.bf16.msra.mxu0 %v576_v3  ;;  %v590_v26 = vld [vmem:[#allocation7 + $0x10] ss:$8 sps:$4 sm:$0xff]   ;;  %v595_v27 = vld [vmem:[#allocation7 + $0x24] ss:$8 sps:$4 sm:$0xff]   ;;  %v593_v28 = vld [vmem:[#allocation7 + $0x20] ss:$8 sps:$4 sm:$0xff]  }
  0x3f   :  { %532 = vmatprep.subr.bf16.mxu0 %v712_v0  ;;  %96 = vperm.xlu0 %574, %v87_v9   ;;  %v598_v29 = vld [vmem:[#allocation7 + $0x34] ss:$8 sps:$4 sm:$0xff]   ;;  %v596_v30 = vld [vmem:[#allocation7 + $0x30] ss:$8 sps:$4 sm:$0xff]   ;;  %v601_v31 = vld [vmem:[#allocation7 + $0x44] ss:$8 sps:$4 sm:$0xff]  }
  0x40   :  { %543 = vmatpush3.bf16.msra.mxu1 %v580_v12  ;;  %v599_v32 = vld [vmem:[#allocation7 + $0x40] ss:$8 sps:$4 sm:$0xff]   ;;  %v604_v33 = vld [vmem:[#allocation7 + $0x54] ss:$8 sps:$4 sm:$0xff]   ;;  %v602_v34 = vld [vmem:[#allocation7 + $0x50] ss:$8 sps:$4 sm:$0xff]  }
  0x41   :  { %544 = vmatprep.subr.bf16.mxu1 %v712_v0  ;;  %v482_v36 = vld [vmem:[%s851_s3] ss:$0 sm:$0xff]  ;;  %v607_v52 = vld [vmem:[#allocation7 + $0x64] ss:$8 sps:$4 sm:$0xff]   ;;  %v610_v54 = vld [vmem:[#allocation7 + $0x74] ss:$8 sps:$4 sm:$0xff]  }
  0x42   :  { %533 = vmatpush3.bf16.msra.mxu0 %v577_v4  ;;  %v488_v40 = vld [vmem:[%s852_s4] ss:$0 sm:$0xff]  ;;  %v608_v55 = vld [vmem:[#allocation7 + $0x70] ss:$8 sps:$4 sm:$0xff]   ;;  %v328_v3 = vshrl.u32 %v327_v2, 7 }
  0x43   :  { %534 = vmatprep.subr.bf16.mxu0 %v712_v0  ;;  %v605_v53 = vld [vmem:[#allocation7 + $0x60] ss:$8 sps:$4 sm:$0xff]  }
  0x44   :  { %545 = vmatpush3.bf16.msra.mxu1 %v581_v16  ;;  %v489_v56 = vld [vmem:[%s854_s6] ss:$0 sm:$0xff]  ;;  %v329_v4 = vsub.s32 0, %v328_v3  ;;  %v333_v6 = vsub.s32 1, %v328_v3  ;;  %s716_s6 = smov [#allocation8]  }
  0x45   :  { %546 = vmatprep.subr.bf16.mxu1 %v712_v0  ;;  %v325_v5 = vld [vmem:[%s856_s8] sm:$0x3]  ;;  %s469_s16 = sshll.u32 %s716_s6, 4  ;;  %s470_s16 = int_to_ptr.vmem [resolvable:$true] %s469_s16 }
  0x46   :  { %535 = vmatpush3.bf16.msra.mxu0 %v139_v15  ;;  %v330_v7 = vrot.slane %v325_v5, %v329_v4  ;;  %v334_v8 = vrot.slane %v325_v5, %v333_v6  ;;  %s677_s17 = scalar_lea.vmem %s470_s16, 512  ;;  %p682_p11 = scmp.lt.s32.totalorder %s470_s16, %s470_s16 }
  0x47   :  { %417 = vmatprep.subr.bf16.mxu0 %v589_v24  ;;  %p678_p10 = scmp.ne.s32.totalorder %s470_s16, %s677_s17  ;;  %p683_p12 = scmp.lt.s32.totalorder %s677_s17, %s677_s17 }
  0x48   :  { %547 = vmatpush3.bf16.msra.mxu1 %v582_v18 }
  0x49   :  { %537 = vmatmul.mubr.msk.bf16.vlgmr.msra.gmra.mrb[0].mxu0 %vm130_vm3, %v77_v17  ;;  %548 = vmatprep.subr.bf16.mxu1 %v712_v0  ;;  %p684_p13 = por %p683_p12, %p682_p11 }
  0x4a   :  { %449 = vmatprep.mubr.bf16.mxu0 %v714_v1  ;;  %418 = vmatpush1.bf16.msra.mxu0 %v587_v23 }
  0x4b   :  { %419 = vmatprep.subr.bf16.mxu0 %v592_v25  ;;  %p685_p0 = pnand %p684_p13, %p678_p10 }
  0x4c   :  { %549 = vmatpush3.bf16.msra.mxu1 %v583_v19 }
  0x4d   :  { %550 = vmatprep.subr.bf16.mxu1 %v712_v0 }
  0x4e   :  { %420 = vmatpush1.bf16.msra.mxu0 %v590_v26 }
  0x4f   :  { %421 = vmatprep.subr.bf16.mxu0 %v595_v27 }
  0x50   :  { %551 = vmatpush3.bf16.msra.mxu1 %v584_v20 }
  0x51   :  { %552 = vmatprep.subr.bf16.mxu1 %v712_v0 }
  0x52   :  { %422 = vmatpush1.bf16.msra.mxu0 %v593_v28 }
  0x53   :  { %423 = vmatprep.subr.bf16.mxu0 %v598_v29 }
  0x54   :  { %553 = vmatpush3.bf16.msra.mxu1 %v585_v21 }
  0x55   :  { %554 = vmatprep.subr.bf16.mxu1 %v712_v0 }
  0x56   :  { %424 = vmatpush1.bf16.msra.mxu0 %v596_v30 }
  0x57   :  { %425 = vmatprep.subr.bf16.mxu0 %v601_v31 }
  0x58   :  { %555 = vmatpush3.bf16.msra.mxu1 %v586_v22 }
  0x5a   :  { %426 = vmatpush1.bf16.msra.mxu0 %v599_v32 }
  0x5b   :  { %427 = vmatprep.subr.bf16.mxu0 %v604_v33 }
  0x5e   :  { %428 = vmatpush1.bf16.msra.mxu0 %v602_v34 }
  0x5f   :  { %429 = vmatprep.subr.bf16.mxu0 %v607_v52 }
  0x62   :  { %430 = vmatpush1.bf16.msra.mxu0 %v605_v53 }
  0x63   :  { %431 = vmatprep.subr.bf16.mxu0 %v610_v54 }
  0x66   :  { %432 = vmatpush1.bf16.msra.mxu0 %v608_v55 }
  0xba   :  { %v92_v35 = vpop.permute.xlu0 %91 }
  0xbb   :  { %v105_v38 = vmul.f32 %v482_v36, %v92_v35 }
  0xbe   :  { %v97_v37 = vpop.permute.xlu0 %96 }
  0xbf   :  { %v106_v41 = vmul.f32 %v482_v36, %v97_v37 }
 0x11c   :  { %v175_v39 = vpop.f32.mrb[0].mxu0 }
 0x11d   :  { %v176_v42 = vadd.f32 %v175_v39, %v105_v38  ;;  %v538_v43 = vpop.f32.mrb[1].mxu0 }
 0x11e   :  { %v178_v44 = vpop.f32.mrb[2].mxu0 }
 0x11f   :  { %v189_v45 = vadd.f32 %v488_v40, %v176_v42  ;;  %v179_v46 = vadd.f32 %v178_v44, %v106_v41  ;;  %v539_v47 = vpop.f32.mrb[3].mxu0 }
 0x121   :  { %v190_v48 = vadd.f32 %v488_v40, %v179_v46  ;;  %v191_v49 = vmax.f32 %v189_v45, 0.0 }
 0x123   :  { %v192_v50 = vmax.f32 %v190_v48, 0.0 }
 0x125   :  { %v193_v51 = vpack.c.bf16 %v192_v50, %v191_v49 }
 0x127   :  { %557 = vmatmul.mubr.bf16.vlgmr.msra.gmra.mrb[0].mxu1 %v193_v51 }
 0x1fa   :  { %v299_v57 = vpop.f32.mrb[0].mxu1 }
 0x1fb   :  { %v300_v58 = vadd.f32 %v489_v56, %v299_v57  ;;  %v558_v59 = vpop.f32.mrb[1].mxu1 }
 0x1fc   :  { %v302_v60 = vpop.f32.mrb[2].mxu1 }
 0x1fd   :  { %v303_v61 = vadd.f32 %v489_v56, %v302_v60  ;;  %v559_v62 = vpop.f32.mrb[3].mxu1  ;;  %v306_v63 = vmax.f32 %v300_v58, 0.0 }
 0x1ff   :  { %v307_v0 = vmax.f32 %v303_v61, 0.0 }
 0x201   :  { %v308_v1 = vpack.c.bf16 %v307_v0, %v306_v63 }
 0x203   :  { %450 = vmatmul.mubr.bf16.vlgmr.msra.gmra.mrb[4].mxu0 %v308_v1 }
 0x2d6   :  { %v451_v9 = vpop.f32.mrb[4].mxu0 }
 0x2d7   :  { %v452_v10 = vadd.f32 %v451_v9, %v330_v7  ;;  %v453_v11 = vpop.f32.mrb[5].mxu0 }
 0x2d8   :  { %v454_v12 = vadd.f32 %v453_v11, %v334_v8  ;;  %v455_v13 = vpop.f32.mrb[6].mxu0 }
 0x2d9   :  { %460 = vst [vmem:[#allocation8] sm:$0xff] %v452_v10  ;;  %v456_v14 = vadd.f32 %v455_v13, %v330_v7  ;;  %v457_v15 = vpop.f32.mrb[7].mxu0 }
 0x2da   :  { %461 = vst [vmem:[#allocation8 + $0x8] sm:$0xff] %v454_v12  ;;  %v458_v16 = vadd.f32 %v457_v15, %v334_v8 }
 0x2db   :  { %462 = vst [vmem:[#allocation8 + $0x10] sm:$0xff] %v456_v14 }
 0x2dc   :  { %463 = vst [vmem:[#allocation8 + $0x18] sm:$0xff] %v458_v16 }
 0x2dd   :  { %688 = shalt.err (!%p685_p0)
}
 0x2de   :  { %s689_s19 = scalar_lea.hbm %s857_s9, 512 }
 0x2df   :  { %p690_p1 = scmp.ne.s32.totalorder %s857_s9, %s689_s19  ;;  %p693_p2 = scmp.lt.u32.totalorder %s689_s19, %s857_s9 }
 0x2e1   :  { %p695_p3 = pnand %p693_p2, %p690_p1 }
 0x2e3   :  { %698 = shalt.err (!%p695_p3)
}
 0x2e4   :  { %s717_s2 = smov 256   ;;  %s718_s12 = smov 16  }
 0x2e5   :  { %475 = dma.vmem_to_hbm [thread:$0]  %s470_s16, 512, %s857_s9, [#allocation4], %s717_s2, %s717_s2, %s718_s12  }
 0x2e6   :  { %703 = dma.done.wait [#allocation4], 512  }
 0x2e7   :  { %704 = vsyncadd [#allocation4], 4294966784 }
 0x2e8   :  { %479 = vsyncpa [#allocation3], 1 }
 0x2e9   :  { %480 = vsyncpa [#allocation6], 1 }
 0x2ea   :  { %481 = vsyncpa [#allocation4], 1 }

</bundles_post_ra>
